<compile_context>
chip_gen: v6e
topology: v6e:2x2x1
jax: 0.10.0
libtpu: 0.0.40
codegen_flags: <defaults>
</compile_context>

<pallas_src>
import numpy as np

import jax
import jax.numpy as jnp
from jax.experimental import pallas as pl
from jax.experimental.pallas import tpu as pltpu

NUM_CLASSES = 7
FEATURE_DIMS = (32, 24, 16)       # synthetic stand-ins for 2048 / 1280 / 1024
KSIZE = 3
C_IN = 3

K_RAW = KSIZE * KSIZE * C_IN      # 27 = im2col patch width
K_PAD = 32                        # K padded to a sublane multiple (col 27 = bias lane)
F_PAD = 128                       # packed conv output width (32+24+16=72 -> 128)
H_PAD = 32                        # packed concat-logits width (3*7=21 -> 32)
OUT_PAD = 128                     # lane-dense kernel output width (7 -> 128)


# ----------------------------- Pallas kernel ------------------------------- #

def _ensemble_kernel(patch_ref, avg_ref, wconv_ref, wcomb_ref, bcomb_ref, out_ref):
    """Fused ensemble: packed conv(+bias) -> ReLU -> GAP (MXU) -> composed head+fusion."""
    # All three members' convs in one matmul; conv bias lives in wconv row 27
    # (patch column 27 is 1.0), so no separate broadcast add.
    conv = jnp.maximum(
        jnp.dot(patch_ref[...], wconv_ref[...], preferred_element_type=jnp.float32),
        0.0)                                                         # ReLU, f32

    # Global average pool as an MXU matmul against the precomputed (bt, bt*hw)
    # block-averaging matrix (1/HW folded in); keeps XLU/VPU free.
    feat = jnp.dot(avg_ref[...], conv, preferred_element_type=jnp.float32)  # (bt, F_PAD)

    # Per-model heads and the fusion Linear pre-composed offline (eval mode:
    # dropout identity, no nonlinearity between them) -> a single matmul.
    out = jnp.dot(feat.astype(wcomb_ref.dtype), wcomb_ref[...],
                  preferred_element_type=jnp.float32) + bcomb_ref[...]
    out_ref[...] = out.astype(out_ref.dtype)                         # lane-dense store


# ------------------------------ wrappers ----------------------------------- #

def pack_params(model_params, fusion_w, fusion_b, matmul_dtype=jnp.float32):
    """Pack per-model weights into fused/padded matrices (done once, tiny)."""
    n_models = len(model_params)
    wconv = jnp.zeros((K_PAD, F_PAD), jnp.float32)
    whead = jnp.zeros((F_PAD, H_PAD), jnp.float32)      # block-diagonal heads
    bhead = jnp.zeros((1, H_PAD), jnp.float32)
    f_off = 0
    for j, (w_c, b_c, w_h, b_h) in enumerate(model_params):
        f = w_c.shape[1]
        wconv = wconv.at[:K_RAW, f_off:f_off + f].set(w_c)
        wconv = wconv.at[K_RAW, f_off:f_off + f].set(b_c[0])   # bias folded into row 27
        whead = whead.at[f_off:f_off + f,
                         j * NUM_CLASSES:(j + 1) * NUM_CLASSES].set(w_h)
        bhead = bhead.at[:, j * NUM_CLASSES:(j + 1) * NUM_CLASSES].set(b_h)
        f_off += f
    wfus = jnp.zeros((H_PAD, OUT_PAD), jnp.float32)
    wfus = wfus.at[:n_models * NUM_CLASSES, :NUM_CLASSES].set(fusion_w)
    bfus = jnp.zeros((1, OUT_PAD), jnp.float32)
    bfus = bfus.at[:, :NUM_CLASSES].set(fusion_b)

    # Compose head + fusion in f32 before any bf16 cast (valid in eval mode).
    wcomb = whead @ wfus                    # (F_PAD, OUT_PAD)
    bcomb = bhead @ wfus + bfus             # (1, OUT_PAD)
    return dict(
        wconv=wconv.astype(matmul_dtype),
        wcomb=wcomb.astype(matmul_dtype),
        bcomb=bcomb,                        # bias stays f32
    )


def im2col(x_nhwc, k=KSIZE):
    """3x3, stride 1, pad 1 patch extraction. Returns (B, H*W, k*k*C)."""
    B, H, W, C = x_nhwc.shape
    xp = jnp.pad(x_nhwc, ((0, 0), (1, 1), (1, 1), (0, 0)))
    cols = []
    for dh in range(k):
        for dw in range(k):
            cols.append(xp[:, dh:dh + H, dw:dw + W, :])
    patches = jnp.stack(cols, axis=-2)                 # (B, H, W, k*k, C)
    return patches.reshape(B, H * W, k * k * C)


def _choose_tiles(B, hw):
    """Split the batch across TensorCores only when each tile amortizes the
    ~0.35us per-step overhead and yields an 8-sublane-aligned output block."""
    if B % 2 == 0:
        bt = B // 2
        if bt >= 8 and bt % 8 == 0 and bt * hw >= 2048:
            return 2
    return 1


def _block_avg_matrix(bt, hw):
    """Static (bt, bt*hw) block-averaging matrix with 1/hw folded in."""
    avg = np.zeros((bt, bt * hw), np.float32)
    for i in range(bt):
        avg[i, i * hw:(i + 1) * hw] = 1.0 / hw
    return jnp.asarray(avg)


def cnn_ensemble_forward(x_nchw, packed, matmul_dtype=jnp.float32):
    """Forward pass matching CNNEnsemble.forward (eval mode), one fused kernel."""
    B = x_nchw.shape[0]
    # Cast activations before im2col so the dominant patches array moves through
    # HBM at matmul_dtype width (halves DMA bytes in the bf16 path).
    x_nhwc = jnp.transpose(x_nchw, (0, 2, 3, 1)).astype(matmul_dtype)   # NCHW -> NHWC
    patches = im2col(x_nhwc)                           # (B, HW, 27)
    _, hw, k = patches.shape
    patches = patches.reshape(B * hw, k)
    patches = jnp.pad(patches, ((0, 0), (0, K_PAD - k)))
    patches = patches.at[:, K_RAW].set(jnp.asarray(1.0, matmul_dtype))  # bias lane

    tiles = _choose_tiles(B, hw)
    bt = B // tiles
    avg = _block_avg_matrix(bt, hw)                    # constant-index GAP operand

    out = pl.pallas_call(
        _ensemble_kernel,
        out_shape=jax.ShapeDtypeStruct((B, OUT_PAD), jnp.float32),
        grid_spec=pltpu.PrefetchScalarGridSpec(
            num_scalar_prefetch=0,
            grid=(tiles,),
            in_specs=[
                pl.BlockSpec((bt * hw, K_PAD), lambda i: (i, 0)),
                pl.BlockSpec((bt, bt * hw), lambda i: (0, 0)),
                pl.BlockSpec((K_PAD, F_PAD), lambda i: (0, 0)),
                pl.BlockSpec((F_PAD, OUT_PAD), lambda i: (0, 0)),
                pl.BlockSpec((1, OUT_PAD), lambda i: (0, 0)),
            ],
            out_specs=pl.BlockSpec((bt, OUT_PAD), lambda i: (i, 0)),
        ),
        compiler_params=pltpu.CompilerParams(
            dimension_semantics=("parallel",)),
    )(patches, avg, packed["wconv"], packed["wcomb"], packed["bcomb"])
    return out[:, :NUM_CLASSES]                        # slice lane-padded output


def reference_forward(x_nchw, model_params, fusion_w, fusion_b):
    """Pure-JAX reference (unfused, f32) for sanity checking."""
    x_nhwc = jnp.transpose(x_nchw, (0, 2, 3, 1))
    patches = im2col(x_nhwc)
    preds = []
    for (w_conv, b_conv, w_head, b_head) in model_params:
        conv = jnp.maximum(patches @ w_conv + b_conv, 0.0)
        feat = jnp.mean(conv, axis=1)
        preds.append(feat @ w_head + b_head)
    combined = jnp.concatenate(preds, axis=1)
    return combined @ fusion_w + fusion_b


# ------------------------------- main --------------------------------------- #

if __name__ == "__main__":
    key = jax.random.PRNGKey(0)
    C, H, W = 3, 16, 16                                 # PyTorch-style NCHW input

    k_x, k_x2, k_p = jax.random.split(key, 3)

    # Deterministic synthetic parameters.
    model_params = []
    keys = jax.random.split(k_p, 2 * len(FEATURE_DIMS) + 1)
    for i, F in enumerate(FEATURE_DIMS):
        kw, kh = keys[2 * i], keys[2 * i + 1]
        w_conv = 0.1 * jax.random.normal(kw, (K_RAW, F), jnp.float32)
        b_conv = 0.05 * jnp.ones((1, F), jnp.float32)
        w_head = 0.1 * jax.random.normal(kh, (F, NUM_CLASSES), jnp.float32)
        b_head = 0.02 * jnp.ones((1, NUM_CLASSES), jnp.float32)
        model_params.append((w_conv, b_conv, w_head, b_head))

    fusion_w = 0.1 * jax.random.normal(
        keys[-1], (len(FEATURE_DIMS) * NUM_CLASSES, NUM_CLASSES), jnp.float32)
    fusion_b = 0.01 * jnp.ones((1, NUM_CLASSES), jnp.float32)

    # --- small batch (B=2): work-aware tiling picks grid=(1,) ---------------
    x = jax.random.normal(k_x, (2, C, H, W), jnp.float32)
    ref = reference_forward(x, model_params, fusion_w, fusion_b)

    packed_f32 = pack_params(model_params, fusion_w, fusion_b, jnp.float32)
    out_f32 = jax.block_until_ready(cnn_ensemble_forward(x, packed_f32, jnp.float32))
    assert out_f32.shape == (2, NUM_CLASSES)
    assert jnp.allclose(out_f32, ref, rtol=1e-3, atol=1e-4), "f32 mismatch vs reference"

    # bf16 matmul-input path (recommended on v5e/v6e/v7x: halves DMA bytes, f32 accum).
    packed_bf16 = pack_params(model_params, fusion_w, fusion_b, jnp.bfloat16)
    out_bf16 = jax.block_until_ready(cnn_ensemble_forward(x, packed_bf16, jnp.bfloat16))
    assert out_bf16.shape == (2, NUM_CLASSES)
    assert jnp.allclose(out_bf16, ref, rtol=3e-2, atol=3e-2), "bf16 mismatch vs reference"

    # --- larger batch (B=16): 2-way "parallel" split, 8-aligned output tiles --
    x_big = jax.random.normal(k_x2, (16, C, H, W), jnp.float32)
    ref_big = reference_forward(x_big, model_params, fusion_w, fusion_b)
    out_big = jax.block_until_ready(cnn_ensemble_forward(x_big, packed_f32, jnp.float32))
    assert out_big.shape == (16, NUM_CLASSES)
    assert jnp.allclose(out_big, ref_big, rtol=1e-3, atol=1e-4), "tiled mismatch vs reference"

    print("KERNEL_OK")
</pallas_src>

<mosaic_0001>
module attributes {stable_mosaic.version = 11 : i64} {
  func.func @_ensemble_kernel(%arg0: i32, %arg1: memref<512x32xf32, #tpu.memory_space<vmem>>, %arg2: memref<2x512xf32, #tpu.memory_space<vmem>>, %arg3: memref<32x128xf32, #tpu.memory_space<vmem>>, %arg4: memref<128x128xf32, #tpu.memory_space<vmem>>, %arg5: memref<1x128xf32, #tpu.memory_space<vmem>>, %arg6: memref<2x128xf32, #tpu.memory_space<vmem>>) attributes {dimension_semantics = [#tpu.dimension_semantics<parallel>], iteration_bounds = array<i64: 1>, scalar_prefetch = 0 : i64, scratch_operands = 0 : i64, tpu.core_type = #tpu.core_type<tc>, window_params = [{transform_indices = @transform_0, window_bounds = array<i64: 512, 32>}, {pipeline_mode = #tpu.pipeline_mode<synchronous>, transform_indices = @transform_1, window_bounds = array<i64: 2, 512>}, {pipeline_mode = #tpu.pipeline_mode<synchronous>, transform_indices = @transform_2, window_bounds = array<i64: 32, 128>}, {pipeline_mode = #tpu.pipeline_mode<synchronous>, transform_indices = @transform_3, window_bounds = array<i64: 128, 128>}, {pipeline_mode = #tpu.pipeline_mode<synchronous>, transform_indices = @transform_4, window_bounds = array<i64: 1, 128>}, {transform_indices = @transform_5, window_bounds = array<i64: 2, 128>}]} {
    %c0 = arith.constant 0 : index
    %c0_0 = arith.constant 0 : index
    %0 = vector.load %arg1[%c0, %c0_0] : memref<512x32xf32, #tpu.memory_space<vmem>>, vector<512x32xf32>
    %c0_1 = arith.constant 0 : index
    %c0_2 = arith.constant 0 : index
    %1 = vector.load %arg3[%c0_1, %c0_2] : memref<32x128xf32, #tpu.memory_space<vmem>>, vector<32x128xf32>
    %cst = arith.constant dense<0.000000e+00> : vector<512x128xf32>
    %2 = tpu.matmul %0, %1, %cst {dimension_numbers = #tpu.dot_dimension_numbers<[1], [0], [0], [1], [0, 0, 1, 1], [], []>} : vector<512x32xf32>, vector<32x128xf32>, vector<512x128xf32> -> vector<512x128xf32>
    %cst_3 = arith.constant 0.000000e+00 : f32
    %3 = vector.broadcast %cst_3 : f32 to vector<512x128xf32>
    %4 = arith.maximumf %2, %3 : vector<512x128xf32>
    %c0_4 = arith.constant 0 : index
    %c0_5 = arith.constant 0 : index
    %5 = vector.load %arg2[%c0_4, %c0_5] : memref<2x512xf32, #tpu.memory_space<vmem>>, vector<2x512xf32>
    %cst_6 = arith.constant dense<0.000000e+00> : vector<2x128xf32>
    %6 = tpu.matmul %5, %4, %cst_6 {dimension_numbers = #tpu.dot_dimension_numbers<[1], [0], [0], [1], [0, 0, 1, 1], [], []>} : vector<2x512xf32>, vector<512x128xf32>, vector<2x128xf32> -> vector<2x128xf32>
    %c0_7 = arith.constant 0 : index
    %c0_8 = arith.constant 0 : index
    %7 = vector.load %arg4[%c0_7, %c0_8] : memref<128x128xf32, #tpu.memory_space<vmem>>, vector<128x128xf32>
    %cst_9 = arith.constant dense<0.000000e+00> : vector<2x128xf32>
    %8 = tpu.matmul %6, %7, %cst_9 {dimension_numbers = #tpu.dot_dimension_numbers<[1], [0], [0], [1], [0, 0, 1, 1], [], []>} : vector<2x128xf32>, vector<128x128xf32>, vector<2x128xf32> -> vector<2x128xf32>
    %c0_10 = arith.constant 0 : index
    %c0_11 = arith.constant 0 : index
    %9 = vector.load %arg5[%c0_10, %c0_11] : memref<1x128xf32, #tpu.memory_space<vmem>>, vector<1x128xf32>
    %10 = vector.broadcast %9 : vector<1x128xf32> to vector<2x128xf32>
    %11 = arith.addf %8, %10 : vector<2x128xf32>
    %c0_12 = arith.constant 0 : index
    %c0_13 = arith.constant 0 : index
    %12 = vector.load %arg6[%c0_12, %c0_13] : memref<2x128xf32, #tpu.memory_space<vmem>>, vector<2x128xf32>
    tpu.vector_store %arg6[%c0_12, %c0_13], %11 {strides = array<i32>} : memref<2x128xf32, #tpu.memory_space<vmem>>, vector<2x128xf32>,
    return
  }
  func.func @transform_0(%arg0: i32) -> (i32, i32) {
    %c0_i32 = arith.constant 0 : i32
    %c0_i32_0 = arith.constant 0 : i32
    return %arg0, %c0_i32 : i32, i32
  }
  func.func @transform_1(%arg0: i32) -> (i32, i32) {
    %c0_i32 = arith.constant 0 : i32
    %c0_i32_0 = arith.constant 0 : i32
    %c0_i32_1 = arith.constant 0 : i32
    return %c0_i32, %c0_i32_0 : i32, i32
  }
  func.func @transform_2(%arg0: i32) -> (i32, i32) {
    %c0_i32 = arith.constant 0 : i32
    %c0_i32_0 = arith.constant 0 : i32
    %c0_i32_1 = arith.constant 0 : i32
    return %c0_i32, %c0_i32_0 : i32, i32
  }
  func.func @transform_3(%arg0: i32) -> (i32, i32) {
    %c0_i32 = arith.constant 0 : i32
    %c0_i32_0 = arith.constant 0 : i32
    %c0_i32_1 = arith.constant 0 : i32
    return %c0_i32, %c0_i32_0 : i32, i32
  }
  func.func @transform_4(%arg0: i32) -> (i32, i32) {
    %c0_i32 = arith.constant 0 : i32
    %c0_i32_0 = arith.constant 0 : i32
    %c0_i32_1 = arith.constant 0 : i32
    return %c0_i32, %c0_i32_0 : i32, i32
  }
  func.func @transform_5(%arg0: i32) -> (i32, i32) {
    %c0_i32 = arith.constant 0 : i32
    %c0_i32_0 = arith.constant 0 : i32
    return %arg0, %c0_i32 : i32, i32
  }
}

</mosaic_0001>

<bundles_post_ra>
// kernel: tpu_custom_call.1
= control target key start
LH: loop header
LB: loop body
LE: loop exit
PB: predicated region body
PF: predicated region fallthrough
CT: control target
= control target key end

     0   :  { %vm89_vm0 = vcmask 261120   ;;  %s1850_s0 = inlined_call_operand.vmem [shape: f32[512,32], index: 0, kind: input, shape index: {}]   ;;  %s1851_s1 = inlined_call_operand.vmem [shape: f32[2,512], index: 1, kind: input, shape index: {}]   ;;  %s1852_s2 = inlined_call_operand.vmem [shape: f32[32,128], index: 2, kind: input, shape index: {}]   ;;  %s1853_s3 = inlined_call_operand.vmem [shape: f32[128,128], index: 3, kind: input, shape index: {}]   ;;  %s1854_s4 = inlined_call_operand.vmem [shape: f32[1,128], index: 4, kind: input, shape index: {}]   ;;  %s1855_s5 = inlined_call_operand.hbm [shape: f32[2,128], index: 5, kind: output, shape index: {}]  }
   0x1   :  { %v88_v0 = vld [vmem:[%s1852_s2 + $0x18] sm:$0xff]  ;;  %v87_v1 = vld [vmem:[%s1852_s2 + $0x10] sm:$0xff]  ;;  %v21_v2 = vld [vmem:[%s1850_s0] sm:$0xff] }
   0x2   :  { %1222 = vmatprep.subr.mxu0 %v88_v0  ;;  %v86_v3 = vld [vmem:[%s1852_s2 + $0x8] sm:$0xff]  ;;  %1230 = vmatprep.mubr.msk.f32.mxu0 %vm89_vm0, %v21_v2  ;;  %v85_v4 = vld [vmem:[%s1852_s2] sm:$0xff]  ;;  %v23_v6 = vld [vmem:[%s1850_s0 + $0x10] sm:$0xff] }
   0x3   :  { %1223 = vmatpush3.msra.mxu0 %v88_v0  ;;  %v22_v5 = vld [vmem:[%s1850_s0 + $0x8] sm:$0xff]  ;;  %v24_v7 = vld [vmem:[%s1850_s0 + $0x18] sm:$0xff]  ;;  %v25_v8 = vld [vmem:[%s1850_s0 + $0x20] sm:$0xff] }
   0x4   :  { %1224 = vmatprep.subr.mxu0 %v87_v1  ;;  %v26_v9 = vld [vmem:[%s1850_s0 + $0x28] sm:$0xff]  ;;  %v27_v10 = vld [vmem:[%s1850_s0 + $0x30] sm:$0xff]  ;;  %v28_v11 = vld [vmem:[%s1850_s0 + $0x38] sm:$0xff] }
   0x5   :  { %1225 = vmatpush3.msra.mxu0 %v87_v1  ;;  %v29_v12 = vld [vmem:[%s1850_s0 + $0x40] sm:$0xff]  ;;  %v30_v13 = vld [vmem:[%s1850_s0 + $0x48] sm:$0xff] }
   0x6   :  { %1226 = vmatprep.subr.mxu0 %v86_v3 }
   0x7   :  { %1227 = vmatpush3.msra.mxu0 %v86_v3 }
   0x8   :  { %1228 = vmatprep.subr.mxu0 %v85_v4 }
   0x9   :  { %1229 = vmatpush3.msra.mxu0 %v85_v4 }
   0xa   :  { %1231 = vmatmul.mubr.msk.f32.vlgmr.msra.gmra.mxu0 %vm89_vm0, %v22_v5 }
   0xb   :  { %1233 = vmatprep.mubr.msk.f32.mxu0 %vm89_vm0, %v23_v6 }
   0xe   :  { %1234 = vmatmul.mubr.msk.f32.gmra.mxu0 %vm89_vm0, %v24_v7 }
   0xf   :  { %1236 = vmatprep.mubr.msk.f32.mxu0 %vm89_vm0, %v25_v8 }
  0x12   :  { %1237 = vmatmul.mubr.msk.f32.gmra.mxu0 %vm89_vm0, %v26_v9 }
  0x13   :  { %1239 = vmatprep.mubr.msk.f32.mxu0 %vm89_vm0, %v27_v10 }
  0x16   :  { %1240 = vmatmul.mubr.msk.f32.gmra.mxu0 %vm89_vm0, %v28_v11 }
  0x17   :  { %1242 = vmatprep.mubr.msk.f32.mxu0 %vm89_vm0, %v29_v12 }
  0x18   :  { %10 = vsyncpa [#allocation3], 0  ;;  %v31_v14 = vld [vmem:[%s1850_s0 + $0x50] sm:$0xff]  ;;  %v32_v15 = vld [vmem:[%s1850_s0 + $0x58] sm:$0xff]  ;;  %v1388_v4 = vmov 1983009808   ;;  %v737_v6 = vlaneseq }
  0x19   :  { %v33_v16 = vld [vmem:[%s1850_s0 + $0x60] sm:$0xff]  ;;  %v34_v17 = vld [vmem:[%s1850_s0 + $0x68] sm:$0xff]  ;;  %v35_v18 = vld [vmem:[%s1850_s0 + $0x70] sm:$0xff]  ;;  %v735_v5 = vunpack.c.l.s4 %v1388_v4  ;;  %vm1390_vm1 = vmmov 0   ;;  %s1391_s30 = smov [#allocation2]  }
  0x1a   :  { %1243 = vmatmul.mubr.msk.f32.gmra.mxu0 %vm89_vm0, %v30_v13  ;;  %v36_v19 = vld [vmem:[%s1850_s0 + $0x78] sm:$0xff]  ;;  %v37_v20 = vld [vmem:[%s1850_s0 + $0x80] sm:$0xff]  ;;  %v38_v21 = vld [vmem:[%s1850_s0 + $0x88] sm:$0xff]  ;;  %v738_v8 = vshrl.u32 %v737_v6, 7  ;;  %s994_s6 = sshll.u32 %s1391_s30, 4  ;;  %s995_s6 = int_to_ptr.vmem [resolvable:$true] %s994_s6 }
  0x1b   :  { %1245 = vmatprep.mubr.msk.f32.mxu0 %vm89_vm0, %v31_v14  ;;  %v39_v22 = vld [vmem:[%s1850_s0 + $0x90] sm:$0xff]  ;;  %v40_v23 = vld [vmem:[%s1850_s0 + $0x98] sm:$0xff]  ;;  %v41_v24 = vld [vmem:[%s1850_s0 + $0xa0] sm:$0xff]  ;;  %v736_v7 = vunpack.c.0.s8 %v735_v5  ;;  %p1371_p1 = scmp.lt.s32.totalorder %s995_s6, %s995_s6 }
  0x1c   :  { %v42_v25 = vld [vmem:[%s1850_s0 + $0xa8] sm:$0xff]  ;;  %v43_v26 = vld [vmem:[%s1850_s0 + $0xb0] sm:$0xff]  ;;  %v44_v27 = vld [vmem:[%s1850_s0 + $0xb8] sm:$0xff] }
  0x1d   :  { %v45_v28 = vld [vmem:[%s1850_s0 + $0xc0] sm:$0xff]  ;;  %v46_v29 = vld [vmem:[%s1850_s0 + $0xc8] sm:$0xff]  ;;  %v47_v30 = vld [vmem:[%s1850_s0 + $0xd0] sm:$0xff]  ;;  %v739_v9 = vsub.s32 %v736_v7, %v738_v8 }
  0x1e   :  { %1246 = vmatmul.mubr.msk.f32.gmra.mxu0 %vm89_vm0, %v32_v15  ;;  %v48_v31 = vld [vmem:[%s1850_s0 + $0xd8] sm:$0xff]  ;;  %v49_v32 = vld [vmem:[%s1850_s0 + $0xe0] sm:$0xff]  ;;  %v50_v33 = vld [vmem:[%s1850_s0 + $0xe8] sm:$0xff] }
  0x1f   :  { %1248 = vmatprep.mubr.msk.f32.mxu0 %vm89_vm0, %v33_v16  ;;  %v51_v34 = vld [vmem:[%s1850_s0 + $0xf0] sm:$0xff]  ;;  %v52_v35 = vld [vmem:[%s1850_s0 + $0xf8] sm:$0xff]  ;;  %v53_v36 = vld [vmem:[%s1850_s0 + $0x100] sm:$0xff] }
  0x20   :  { %v54_v37 = vld [vmem:[%s1850_s0 + $0x108] sm:$0xff]  ;;  %v55_v38 = vld [vmem:[%s1850_s0 + $0x110] sm:$0xff]  ;;  %v56_v39 = vld [vmem:[%s1850_s0 + $0x118] sm:$0xff] }
  0x21   :  { %v57_v40 = vld [vmem:[%s1850_s0 + $0x120] sm:$0xff]  ;;  %v58_v41 = vld [vmem:[%s1850_s0 + $0x128] sm:$0xff]  ;;  %v59_v42 = vld [vmem:[%s1850_s0 + $0x130] sm:$0xff] }
  0x22   :  { %1249 = vmatmul.mubr.msk.f32.gmra.mxu0 %vm89_vm0, %v34_v17  ;;  %v60_v43 = vld [vmem:[%s1850_s0 + $0x138] sm:$0xff]  ;;  %v61_v44 = vld [vmem:[%s1850_s0 + $0x140] sm:$0xff]  ;;  %v62_v45 = vld [vmem:[%s1850_s0 + $0x148] sm:$0xff] }
  0x23   :  { %1251 = vmatprep.mubr.msk.f32.mxu0 %vm89_vm0, %v35_v18  ;;  %v63_v46 = vld [vmem:[%s1850_s0 + $0x150] sm:$0xff]  ;;  %v64_v47 = vld [vmem:[%s1850_s0 + $0x158] sm:$0xff]  ;;  %v65_v48 = vld [vmem:[%s1850_s0 + $0x160] sm:$0xff] }
  0x24   :  { %v66_v49 = vld [vmem:[%s1850_s0 + $0x168] sm:$0xff]  ;;  %v67_v50 = vld [vmem:[%s1850_s0 + $0x170] sm:$0xff]  ;;  %v68_v51 = vld [vmem:[%s1850_s0 + $0x178] sm:$0xff] }
  0x25   :  { %v69_v52 = vld [vmem:[%s1850_s0 + $0x180] sm:$0xff]  ;;  %v70_v53 = vld [vmem:[%s1850_s0 + $0x188] sm:$0xff]  ;;  %v71_v54 = vld [vmem:[%s1850_s0 + $0x190] sm:$0xff] }
  0x26   :  { %1252 = vmatmul.mubr.msk.f32.gmra.mxu0 %vm89_vm0, %v36_v19  ;;  %v72_v55 = vld [vmem:[%s1850_s0 + $0x198] sm:$0xff]  ;;  %v73_v56 = vld [vmem:[%s1850_s0 + $0x1a0] sm:$0xff]  ;;  %v74_v57 = vld [vmem:[%s1850_s0 + $0x1a8] sm:$0xff] }
  0x27   :  { %1254 = vmatprep.mubr.msk.f32.mxu0 %vm89_vm0, %v37_v20  ;;  %v75_v58 = vld [vmem:[%s1850_s0 + $0x1b0] sm:$0xff]  ;;  %v76_v59 = vld [vmem:[%s1850_s0 + $0x1b8] sm:$0xff]  ;;  %v77_v60 = vld [vmem:[%s1850_s0 + $0x1c0] sm:$0xff] }
  0x28   :  { %v78_v61 = vld [vmem:[%s1850_s0 + $0x1c8] sm:$0xff]  ;;  %v79_v62 = vld [vmem:[%s1850_s0 + $0x1d0] sm:$0xff]  ;;  %v80_v63 = vld [vmem:[%s1850_s0 + $0x1d8] sm:$0xff] }
  0x29   :  { %v81_v0 = vld [vmem:[%s1850_s0 + $0x1e0] sm:$0xff]  ;;  %v82_v1 = vld [vmem:[%s1850_s0 + $0x1e8] sm:$0xff]  ;;  %v83_v2 = vld [vmem:[%s1850_s0 + $0x1f0] sm:$0xff] }
  0x2a   :  { %1255 = vmatmul.mubr.msk.f32.gmra.mxu0 %vm89_vm0, %v38_v21  ;;  %v84_v3 = vld [vmem:[%s1850_s0 + $0x1f8] sm:$0xff]  ;;  %v731_v10 = vld [vmem:[%s1851_s1] sm:$0xff] }
  0x2b   :  { %1257 = vmatprep.mubr.msk.f32.mxu0 %vm89_vm0, %v39_v22  ;;  %v1693_v11 = vrot.slane %v731_v10, %v739_v9 }
  0x2d   :  { %v748_v12 = vcombine.high %v1693_v11, %v1693_v11 }
  0x2e   :  { %1258 = vmatmul.mubr.msk.f32.gmra.mxu0 %vm89_vm0, %v40_v23 }
  0x2f   :  { %1260 = vmatprep.mubr.msk.f32.mxu0 %vm89_vm0, %v41_v24  ;;  %818 = vmatprep.mubr.f32.mxu1 %v748_v12 }
  0x32   :  { %1261 = vmatmul.mubr.msk.f32.gmra.mxu0 %vm89_vm0, %v42_v25  ;;  %v733_v25 = vcombine.high %v731_v10, %v731_v10 }
  0x33   :  { %1263 = vmatprep.mubr.msk.f32.mxu0 %vm89_vm0, %v43_v26 }
  0x36   :  { %1264 = vmatmul.mubr.msk.f32.gmra.mxu0 %vm89_vm0, %v44_v27 }
  0x37   :  { %1266 = vmatprep.mubr.msk.f32.mxu0 %vm89_vm0, %v45_v28  ;;  %v1715_v28 = vrot.slane %v733_v25, %v739_v9 }
  0x3a   :  { %1267 = vmatmul.mubr.msk.f32.gmra.mxu0 %vm89_vm0, %v46_v29 }
  0x3b   :  { %1269 = vmatprep.mubr.msk.f32.mxu0 %vm89_vm0, %v47_v30 }
  0x3e   :  { %1270 = vmatmul.mubr.msk.f32.gmra.mxu0 %vm89_vm0, %v48_v31 }
  0x3f   :  { %1272 = vmatprep.mubr.msk.f32.mxu0 %vm89_vm0, %v49_v32 }
  0x42   :  { %1273 = vmatmul.mubr.msk.f32.gmra.mxu0 %vm89_vm0, %v50_v33 }
  0x43   :  { %1275 = vmatprep.mubr.msk.f32.mxu0 %vm89_vm0, %v51_v34 }
  0x46   :  { %1276 = vmatmul.mubr.msk.f32.gmra.mxu0 %vm89_vm0, %v52_v35 }
  0x47   :  { %1278 = vmatprep.mubr.msk.f32.mxu0 %vm89_vm0, %v53_v36 }
  0x4a   :  { %1279 = vmatmul.mubr.msk.f32.gmra.mxu0 %vm89_vm0, %v54_v37 }
  0x4b   :  { %1281 = vmatprep.mubr.msk.f32.mxu0 %vm89_vm0, %v55_v38 }
  0x4e   :  { %1282 = vmatmul.mubr.msk.f32.gmra.mxu0 %vm89_vm0, %v56_v39 }
  0x4f   :  { %1284 = vmatprep.mubr.msk.f32.mxu0 %vm89_vm0, %v57_v40 }
  0x52   :  { %1285 = vmatmul.mubr.msk.f32.gmra.mxu0 %vm89_vm0, %v58_v41 }
  0x53   :  { %1287 = vmatprep.mubr.msk.f32.mxu0 %vm89_vm0, %v59_v42 }
  0x56   :  { %1288 = vmatmul.mubr.msk.f32.gmra.mxu0 %vm89_vm0, %v60_v43 }
  0x57   :  { %1290 = vmatprep.mubr.msk.f32.mxu0 %vm89_vm0, %v61_v44 }
  0x5a   :  { %1291 = vmatmul.mubr.msk.f32.gmra.mxu0 %vm89_vm0, %v62_v45 }
  0x5b   :  { %1293 = vmatprep.mubr.msk.f32.mxu0 %vm89_vm0, %v63_v46 }
  0x5e   :  { %1294 = vmatmul.mubr.msk.f32.gmra.mxu0 %vm89_vm0, %v64_v47 }
  0x5f   :  { %1296 = vmatprep.mubr.msk.f32.mxu0 %vm89_vm0, %v65_v48 }
  0x62   :  { %1297 = vmatmul.mubr.msk.f32.gmra.mxu0 %vm89_vm0, %v66_v49 }
  0x63   :  { %1299 = vmatprep.mubr.msk.f32.mxu0 %vm89_vm0, %v67_v50 }
  0x66   :  { %1300 = vmatmul.mubr.msk.f32.gmra.mxu0 %vm89_vm0, %v68_v51 }
  0x67   :  { %1302 = vmatprep.mubr.msk.f32.mxu0 %vm89_vm0, %v69_v52 }
  0x6a   :  { %1303 = vmatmul.mubr.msk.f32.gmra.mxu0 %vm89_vm0, %v70_v53 }
  0x6b   :  { %1305 = vmatprep.mubr.msk.f32.mxu0 %vm89_vm0, %v71_v54 }
  0x6e   :  { %1306 = vmatmul.mubr.msk.f32.gmra.mxu0 %vm89_vm0, %v72_v55 }
  0x6f   :  { %1308 = vmatprep.mubr.msk.f32.mxu0 %vm89_vm0, %v73_v56 }
  0x72   :  { %1309 = vmatmul.mubr.msk.f32.gmra.mxu0 %vm89_vm0, %v74_v57 }
  0x73   :  { %1311 = vmatprep.mubr.msk.f32.mxu0 %vm89_vm0, %v75_v58 }
  0x76   :  { %1312 = vmatmul.mubr.msk.f32.gmra.mxu0 %vm89_vm0, %v76_v59 }
  0x77   :  { %1314 = vmatprep.mubr.msk.f32.mxu0 %vm89_vm0, %v77_v60 }
  0x7a   :  { %1315 = vmatmul.mubr.msk.f32.gmra.mxu0 %vm89_vm0, %v78_v61 }
  0x7b   :  { %1317 = vmatprep.mubr.msk.f32.mxu0 %vm89_vm0, %v79_v62 }
  0x7e   :  { %1318 = vmatmul.mubr.msk.f32.gmra.mxu0 %vm89_vm0, %v80_v63 }
  0x7f   :  { %1320 = vmatprep.mubr.msk.f32.mxu0 %vm89_vm0, %v81_v0 }
  0x82   :  { %1321 = vmatmul.mubr.msk.f32.gmra.mxu0 %vm89_vm0, %v82_v1 }
  0x83   :  { %1323 = vmatprep.mubr.msk.f32.mxu0 %vm89_vm0, %v83_v2 }
  0x86   :  { %1324 = vmatmul.mubr.msk.f32.gmra.mxu0 %vm89_vm0, %v84_v3 }
  0xca   :  { %v1697_v13 = vpop.f32.mrf.mxu0 }
  0xcc   :  { %v1699_v14 = vpop.f32.mrf.mxu0 }
  0xce   :  { %v1701_v15 = vpop.f32.mrf.mxu0 }
  0xd0   :  { %v1703_v16 = vpop.f32.mrf.mxu0 }
  0xd2   :  { %v1705_v17 = vpop.f32.mrf.mxu0 }
  0xd4   :  { %v1707_v18 = vpop.f32.mrf.mxu0 }
  0xd6   :  { %v1709_v19 = vpop.f32.mrf.mxu0 }
  0xd7   :  { %v674_v7 = vmax.f32 %v1709_v19, 0.0 }
  0xd8   :  { %v1711_v20 = vpop.f32.mrf.mxu0 }
  0xd9   :  { %v673_v10 = vmax.f32 %v1711_v20, 0.0 }
  0xda   :  { %v1244_v21 = vpop.f32.mrf.mxu0 }
  0xdb   :  { %v676_v1 = vmax.f32 %v1244_v21, 0.0 }
  0xdc   :  { %v1713_v22 = vpop.f32.mrf.mxu0 }
  0xdd   :  { %v675_v4 = vmax.f32 %v1713_v22, 0.0  ;;  %v672_v22 = vmax.f32 %v1705_v17, 0.0 }
  0xde   :  { %v1247_v23 = vpop.f32.mrf.mxu0 }
  0xdf   :  { %v678_v59 = vmax.f32 %v1247_v23, 0.0 }
  0xe0   :  { %v398_v24 = vpop.f32.mrf.mxu0 }
  0xe1   :  { %v677_v62 = vmax.f32 %v398_v24, 0.0  ;;  %v671_v24 = vmax.f32 %v1707_v18, 0.0 }
  0xe2   :  { %v1250_v26 = vpop.f32.mrf.mxu0 }
  0xe3   :  { %v680_v53 = vmax.f32 %v1250_v26, 0.0  ;;  %v670_v26 = vmax.f32 %v1701_v15, 0.0  ;;  %v667_v15 = vmax.f32 %v1699_v14, 0.0 }
  0xe4   :  { %v408_v27 = vpop.f32.mrf.mxu0 }
  0xe5   :  { %v679_v56 = vmax.f32 %v408_v27, 0.0 }
  0xe6   :  { %v1253_v29 = vpop.f32.mrf.mxu0 }
  0xe7   :  { %v682_v47 = vmax.f32 %v1253_v29, 0.0  ;;  %v669_v29 = vmax.f32 %v1703_v16, 0.0 }
  0xe8   :  { %v418_v30 = vpop.f32.mrf.mxu0 }
  0xe9   :  { %v681_v50 = vmax.f32 %v418_v30, 0.0 }
  0xea   :  { %v1717_v31 = vpop.f32.mrf.mxu0 }
  0xeb   :  { %v684_v18 = vmax.f32 %v1717_v31, 0.0 }
  0xec   :  { %v1719_v32 = vpop.f32.mrf.mxu0 }
  0xee   :  { %v1721_v33 = vpop.f32.mrf.mxu0 }
  0xef   :  { %v686_v20 = vmax.f32 %v1721_v33, 0.0  ;;  %v683_v33 = vmax.f32 %v1719_v32, 0.0 }
  0xf0   :  { %v1723_v34 = vpop.f32.mrf.mxu0 }
  0xf1   :  { %v685_v17 = vmax.f32 %v1723_v34, 0.0  ;;  %v749_v34 = vcombine.high %v1715_v28, %v1715_v28 }
  0xf2   :  { %v1725_v35 = vpop.f32.mrf.mxu0 }
  0xf3   :  { %v688_v21 = vmax.f32 %v1725_v35, 0.0  ;;  %v668_v35 = vmax.f32 %v1697_v13, 0.0 }
  0xf4   :  { %v1727_v36 = vpop.f32.mrf.mxu0 }
  0xf5   :  { %v687_v19 = vmax.f32 %v1727_v36, 0.0 }
  0xf6   :  { %v1265_v37 = vpop.f32.mrf.mxu0 }
  0xf7   :  { %v690_v6 = vmax.f32 %v1265_v37, 0.0 }
  0xf8   :  { %v458_v38 = vpop.f32.mrf.mxu0 }
  0xf9   :  { %v689_v9 = vmax.f32 %v458_v38, 0.0 }
  0xfa   :  { %v1268_v39 = vpop.f32.mrf.mxu0 }
  0xfb   :  { %v692_v0 = vmax.f32 %v1268_v39, 0.0 }
  0xfc   :  { %v468_v40 = vpop.f32.mrf.mxu0 }
  0xfd   :  { %v691_v3 = vmax.f32 %v468_v40, 0.0 }
  0xfe   :  { %v1271_v41 = vpop.f32.mrf.mxu0 }
  0xff   :  { %v694_v58 = vmax.f32 %v1271_v41, 0.0 }
 0x100   :  { %v478_v42 = vpop.f32.mrf.mxu0 }
 0x101   :  { %v693_v61 = vmax.f32 %v478_v42, 0.0 }
 0x102   :  { %v1274_v43 = vpop.f32.mrf.mxu0 }
 0x103   :  { %v696_v52 = vmax.f32 %v1274_v43, 0.0 }
 0x104   :  { %v488_v44 = vpop.f32.mrf.mxu0 }
 0x105   :  { %v695_v55 = vmax.f32 %v488_v44, 0.0 }
 0x106   :  { %v1277_v45 = vpop.f32.mrf.mxu0 }
 0x107   :  { %v698_v46 = vmax.f32 %v1277_v45, 0.0 }
 0x108   :  { %v498_v48 = vpop.f32.mrf.mxu0 }
 0x109   :  { %v697_v49 = vmax.f32 %v498_v48, 0.0  ;;  %1135 = vmatprep.subr.mxu1 %v698_v46 }
 0x10a   :  { %v1729_v51 = vpop.f32.mrf.mxu0  ;;  %1136 = vmatpush3.msra.mxu1 %v682_v47 }
 0x10b   :  { %1137 = vmatprep.subr.mxu1 %v697_v49 }
 0x10c   :  { %v1731_v54 = vpop.f32.mrf.mxu0  ;;  %1138 = vmatpush3.msra.mxu1 %v681_v50 }
 0x10d   :  { %1139 = vmatprep.subr.mxu1 %v696_v52 }
 0x10e   :  { %v1733_v57 = vpop.f32.mrf.mxu0  ;;  %1140 = vmatpush3.msra.mxu1 %v680_v53 }
 0x10f   :  { %1141 = vmatprep.subr.mxu1 %v695_v55 }
 0x110   :  { %v1735_v60 = vpop.f32.mrf.mxu0  ;;  %1142 = vmatpush3.msra.mxu1 %v679_v56 }
 0x111   :  { %1143 = vmatprep.subr.mxu1 %v694_v58 }
 0x112   :  { %v1737_v63 = vpop.f32.mrf.mxu0  ;;  %1144 = vmatpush3.msra.mxu1 %v678_v59 }
 0x113   :  { %1145 = vmatprep.subr.mxu1 %v693_v61 }
 0x114   :  { %v1739_v2 = vpop.f32.mrf.mxu0  ;;  %1146 = vmatpush3.msra.mxu1 %v677_v62 }
 0x115   :  { %1147 = vmatprep.subr.mxu1 %v692_v0 }
 0x116   :  { %v1742_v5 = vpop.f32.mrf.mxu0  ;;  %1148 = vmatpush3.msra.mxu1 %v676_v1 }
 0x117   :  { %1149 = vmatprep.subr.mxu1 %v691_v3 }
 0x118   :  { %v1745_v8 = vpop.f32.mrf.mxu0  ;;  %1150 = vmatpush3.msra.mxu1 %v675_v4 }
 0x119   :  { %1151 = vmatprep.subr.mxu1 %v690_v6 }
 0x11a   :  { %v1748_v12 = vpop.f32.mrf.mxu0  ;;  %1152 = vmatpush3.msra.mxu1 %v674_v7 }
 0x11b   :  { %1153 = vmatprep.subr.mxu1 %v689_v9  ;;  %v708_v4 = vmax.f32 %v1748_v12, 0.0  ;;  %v704_v12 = vmax.f32 %v1737_v63, 0.0 }
 0x11c   :  { %v1752_v23 = vpop.f32.mrf.mxu0  ;;  %1154 = vmatpush3.msra.mxu1 %v673_v10  ;;  %v706_v10 = vmax.f32 %v1742_v5, 0.0  ;;  %v702_v5 = vmax.f32 %v1733_v57, 0.0  ;;  %v909_v57 = vld [vmem:[%s1853_s3 + $0x78] sm:$0xff] }
 0x11d   :  { %1155 = vmatprep.subr.mxu1 %v688_v21  ;;  %v707_v7 = vmax.f32 %v1752_v23, 0.0  ;;  %v703_v23 = vmax.f32 %v1739_v2, 0.0 }
 0x11e   :  { %v1756_v25 = vpop.f32.mrf.mxu0  ;;  %1156 = vmatpush3.msra.mxu1 %v672_v22  ;;  %v705_v22 = vmax.f32 %v1745_v8, 0.0  ;;  %v701_v8 = vmax.f32 %v1735_v60, 0.0  ;;  %v1389_v60 = vmov 0.0  }
 0x11f   :  { %1157 = vmatprep.subr.mxu1 %v687_v19  ;;  %v710_v62 = vmax.f32 %v1756_v25, 0.0 }
 0x120   :  { %v1760_v27 = vpop.f32.mrf.mxu0  ;;  %1158 = vmatpush3.msra.mxu1 %v671_v24 }
 0x121   :  { %1159 = vmatprep.subr.mxu1 %v686_v20  ;;  %v709_v1 = vmax.f32 %v1760_v27, 0.0  ;;  %v699_v27 = vmax.f32 %v1731_v54, 0.0  ;;  %v907_v54 = vld [vmem:[%s1853_s3 + $0x68] sm:$0xff] }
 0x122   :  { %v1298_v30 = vpop.f32.mrf.mxu0  ;;  %1160 = vmatpush3.msra.mxu1 %v670_v26  ;;  %v700_v26 = vmax.f32 %v1729_v51, 0.0  ;;  %v908_v51 = vld [vmem:[%s1853_s3 + $0x70] sm:$0xff] }
 0x123   :  { %1161 = vmatprep.subr.mxu1 %v685_v17  ;;  %v712_v56 = vmax.f32 %v1298_v30, 0.0  ;;  %v905_v17 = vld [vmem:[%s1853_s3 + $0x58] sm:$0xff]  ;;  %v903_v30 = vld [vmem:[%s1853_s3 + $0x48] sm:$0xff] }
 0x124   :  { %v568_v36 = vpop.f32.mrf.mxu0  ;;  %1162 = vmatpush3.msra.mxu1 %v669_v29  ;;  %v904_v29 = vld [vmem:[%s1853_s3 + $0x50] sm:$0xff] }
 0x125   :  { %1163 = vmatprep.subr.mxu1 %v684_v18  ;;  %v711_v59 = vmax.f32 %v568_v36, 0.0  ;;  %v902_v18 = vld [vmem:[%s1853_s3 + $0x40] sm:$0xff]  ;;  %v900_v36 = vld [vmem:[%s1853_s3 + $0x30] sm:$0xff] }
 0x126   :  { %v1301_v37 = vpop.f32.mrf.mxu0  ;;  %1164 = vmatpush3.msra.mxu1 %v668_v35  ;;  %v901_v35 = vld [vmem:[%s1853_s3 + $0x38] sm:$0xff] }
 0x127   :  { %1165 = vmatprep.subr.mxu1 %v683_v33  ;;  %v714_v49 = vmax.f32 %v1301_v37, 0.0  ;;  %v899_v33 = vld [vmem:[%s1853_s3 + $0x28] sm:$0xff]  ;;  %v897_v37 = vld [vmem:[%s1853_s3 + $0x18] sm:$0xff] }
 0x128   :  { %v578_v16 = vpop.f32.mrf.mxu0  ;;  %1166 = vmatpush3.msra.mxu1 %v667_v15  ;;  %v898_v15 = vld [vmem:[%s1853_s3 + $0x20] sm:$0xff] }
 0x129   :  { %819 = vmatmul.mubr.f32.vlgmr.msra.gmra.mxu1 %v1693_v11  ;;  %v713_v53 = vmax.f32 %v578_v16, 0.0  ;;  %v895_v16 = vld [vmem:[%s1853_s3 + $0x8] sm:$0xff] }
 0x12a   :  { %v1771_v31 = vpop.f32.mrf.mxu0  ;;  %888 = vmatprep.mubr.f32.mxu1 %v749_v34  ;;  %v896_v34 = vld [vmem:[%s1853_s3 + $0x10] sm:$0xff] }
 0x12b   :  { %v716_v63 = vmax.f32 %v1771_v31, 0.0  ;;  %v894_v31 = vld [vmem:[%s1853_s3] sm:$0xff] }
 0x12c   :  { %v1773_v13 = vpop.f32.mrf.mxu0 }
 0x12d   :  { %v715_v2 = vmax.f32 %v1773_v13, 0.0 }
 0x12e   :  { %v1775_v38 = vpop.f32.mrf.mxu0 }
 0x12f   :  { %v718_v25 = vmax.f32 %v1775_v38, 0.0 }
 0x130   :  { %v1777_v32 = vpop.f32.mrf.mxu0 }
 0x131   :  { %v717_v20 = vmax.f32 %v1777_v32, 0.0 }
 0x132   :  { %v1310_v14 = vpop.f32.mrf.mxu0 }
 0x133   :  { %v720_v19 = vmax.f32 %v1310_v14, 0.0 }
 0x134   :  { %v608_v39 = vpop.f32.mrf.mxu0 }
 0x135   :  { %v719_v24 = vmax.f32 %v608_v39, 0.0 }
 0x136   :  { %v1313_v40 = vpop.f32.mrf.mxu0 }
 0x137   :  { %v722_v9 = vmax.f32 %v1313_v40, 0.0 }
 0x138   :  { %v618_v41 = vpop.f32.mrf.mxu0 }
 0x139   :  { %v721_v21 = vmax.f32 %v618_v41, 0.0 }
 0x13a   :  { %v1316_v42 = vpop.f32.mrf.mxu0 }
 0x13b   :  { %v724_v3 = vmax.f32 %v1316_v42, 0.0  ;;  %v1066_v42 = vld [vmem:[%s1854_s4] ss:$0 sm:$0xff] }
 0x13c   :  { %v628_v43 = vpop.f32.mrf.mxu0 }
 0x13d   :  { %v723_v6 = vmax.f32 %v628_v43, 0.0 }
 0x13e   :  { %v1319_v44 = vpop.f32.mrf.mxu0 }
 0x13f   :  { %v726_v61 = vmax.f32 %v1319_v44, 0.0 }
 0x140   :  { %v638_v45 = vpop.f32.mrf.mxu0 }
 0x141   :  { %v725_v0 = vmax.f32 %v638_v45, 0.0 }
 0x142   :  { %v1322_v46 = vpop.f32.mrf.mxu0 }
 0x143   :  { %v728_v55 = vmax.f32 %v1322_v46, 0.0 }
 0x144   :  { %v648_v47 = vpop.f32.mrf.mxu0 }
 0x145   :  { %v727_v58 = vmax.f32 %v648_v47, 0.0 }
 0x146   :  { %v1325_v11 = vpop.f32.mrf.mxu0 }
 0x147   :  { %v730_v48 = vmax.f32 %v1325_v11, 0.0 }
 0x148   :  { %v658_v50 = vpop.f32.mrf.mxu0 }
 0x149   :  { %v729_v52 = vmax.f32 %v658_v50, 0.0  ;;  %1170 = vmatprep.subr.mxu1 %v730_v48 }
 0x14a   :  { %1171 = vmatpush3.msra.mxu1 %v714_v49 }
 0x14b   :  { %1172 = vmatprep.subr.mxu1 %v729_v52 }
 0x14c   :  { %1173 = vmatpush3.msra.mxu1 %v713_v53 }
 0x14d   :  { %1174 = vmatprep.subr.mxu1 %v728_v55 }
 0x14e   :  { %1175 = vmatpush3.msra.mxu1 %v712_v56 }
 0x14f   :  { %1176 = vmatprep.subr.mxu1 %v727_v58 }
 0x150   :  { %1177 = vmatpush3.msra.mxu1 %v711_v59 }
 0x151   :  { %1178 = vmatprep.subr.mxu1 %v726_v61 }
 0x152   :  { %1179 = vmatpush3.msra.mxu1 %v710_v62 }
 0x153   :  { %1180 = vmatprep.subr.mxu1 %v725_v0 }
 0x154   :  { %1181 = vmatpush3.msra.mxu1 %v709_v1 }
 0x155   :  { %1182 = vmatprep.subr.mxu1 %v724_v3 }
 0x156   :  { %1183 = vmatpush3.msra.mxu1 %v708_v4 }
 0x157   :  { %1184 = vmatprep.subr.mxu1 %v723_v6 }
 0x158   :  { %1185 = vmatpush3.msra.mxu1 %v707_v7 }
 0x159   :  { %1186 = vmatprep.subr.mxu1 %v722_v9 }
 0x15a   :  { %1187 = vmatpush3.msra.mxu1 %v706_v10 }
 0x15b   :  { %1188 = vmatprep.subr.mxu1 %v721_v21 }
 0x15c   :  { %1189 = vmatpush3.msra.mxu1 %v705_v22 }
 0x15d   :  { %1190 = vmatprep.subr.mxu1 %v720_v19 }
 0x15e   :  { %1191 = vmatpush3.msra.mxu1 %v704_v12 }
 0x15f   :  { %1192 = vmatprep.subr.mxu1 %v719_v24 }
 0x160   :  { %1193 = vmatpush3.msra.mxu1 %v703_v23 }
 0x161   :  { %1194 = vmatprep.subr.mxu1 %v718_v25 }
 0x162   :  { %1195 = vmatpush3.msra.mxu1 %v702_v5 }
 0x163   :  { %1196 = vmatprep.subr.mxu1 %v717_v20 }
 0x164   :  { %1197 = vmatpush3.msra.mxu1 %v701_v8 }
 0x165   :  { %1198 = vmatprep.subr.mxu1 %v716_v63 }
 0x166   :  { %1199 = vmatpush3.msra.mxu1 %v700_v26 }
 0x167   :  { %1200 = vmatprep.subr.mxu1 %v715_v2 }
 0x168   :  { %1201 = vmatpush3.msra.mxu1 %v699_v27 }
 0x169   :  { %889 = vmatmul.mubr.f32.vlgmr.msra.gmra.mxu1 %v1715_v28  ;;  %1326 = vmatprep.subr.mxu1 %v1389_v60  ;;  %v906_v28 = vld [vmem:[%s1853_s3 + $0x60] sm:$0xff]  ;;  %s1366_s3 = scalar_lea.vmem %s995_s6, 32 }
 0x16a   :  { %1327 = vmatpush3.msra.mxu1 %v909_v57  ;;  %1358 = vmatprep.mubr.msk.f32.mxu1 %vm1390_vm1, %v1389_v60  ;;  %p1367_p0 = scmp.ne.s32.totalorder %s995_s6, %s1366_s3  ;;  %p1372_p2 = scmp.lt.s32.totalorder %s1366_s3, %s1366_s3 }
 0x16b   :  { %1328 = vmatprep.subr.mxu1 %v1389_v60 }
 0x16c   :  { %1329 = vmatpush3.msra.mxu1 %v908_v51  ;;  %p1373_p3 = por %p1372_p2, %p1371_p1 }
 0x16d   :  { %1330 = vmatprep.subr.mxu1 %v1389_v60 }
 0x16e   :  { %1331 = vmatpush3.msra.mxu1 %v907_v54  ;;  %p1374_p4 = pnand %p1373_p3, %p1367_p0 }
 0x16f   :  { %1332 = vmatprep.subr.mxu1 %v1389_v60 }
 0x170   :  { %1333 = vmatpush3.msra.mxu1 %v906_v28 }
 0x171   :  { %1334 = vmatprep.subr.mxu1 %v1389_v60 }
 0x172   :  { %1335 = vmatpush3.msra.mxu1 %v905_v17 }
 0x173   :  { %1336 = vmatprep.subr.mxu1 %v1389_v60 }
 0x174   :  { %1337 = vmatpush3.msra.mxu1 %v904_v29 }
 0x175   :  { %1338 = vmatprep.subr.mxu1 %v1389_v60 }
 0x176   :  { %1339 = vmatpush3.msra.mxu1 %v903_v30 }
 0x177   :  { %1340 = vmatprep.subr.mxu1 %v1389_v60 }
 0x178   :  { %1341 = vmatpush3.msra.mxu1 %v902_v18 }
 0x179   :  { %1342 = vmatprep.subr.mxu1 %v1389_v60 }
 0x17a   :  { %1343 = vmatpush3.msra.mxu1 %v901_v35 }
 0x17b   :  { %1344 = vmatprep.subr.mxu1 %v1389_v60 }
 0x17c   :  { %1345 = vmatpush3.msra.mxu1 %v900_v36 }
 0x17d   :  { %1346 = vmatprep.subr.mxu1 %v1389_v60 }
 0x17e   :  { %1347 = vmatpush3.msra.mxu1 %v899_v33 }
 0x17f   :  { %1348 = vmatprep.subr.mxu1 %v1389_v60 }
 0x180   :  { %1349 = vmatpush3.msra.mxu1 %v898_v15 }
 0x181   :  { %1350 = vmatprep.subr.mxu1 %v1389_v60 }
 0x182   :  { %1351 = vmatpush3.msra.mxu1 %v897_v37 }
 0x183   :  { %1352 = vmatprep.subr.mxu1 %v1389_v60 }
 0x184   :  { %1353 = vmatpush3.msra.mxu1 %v896_v34 }
 0x185   :  { %1354 = vmatprep.subr.mxu1 %v1389_v60 }
 0x186   :  { %1355 = vmatpush3.msra.mxu1 %v895_v16 }
 0x187   :  { %1356 = vmatprep.subr.mxu1 %v1389_v60 }
 0x188   :  { %1357 = vmatpush3.msra.mxu1 %v894_v31 }
 0x1e9   :  { %v1167_v13 = vpop.f32.mrf.mxu1 }
 0x1eb   :  { %v1168_v38 = vpop.f32.mrf.mxu1 }
 0x1ec   :  { %v1169_v39 = vadd.f32 %v1168_v38, %v1167_v13 }
 0x229   :  { %v1202_v32 = vpop.f32.mrf.mxu1 }
 0x22b   :  { %v1203_v14 = vpop.f32.mrf.mxu1 }
 0x22c   :  { %v1204_v40 = vadd.f32 %v1203_v14, %v1202_v32 }
 0x22e   :  { %v891_v41 = vadd.f32 %v1204_v40, %v1169_v39 }
 0x230   :  { %1359 = vmatmul.mubr.f32.vlgmr.msra.gmra.mxu1 %v891_v41 }
 0x2f0   :  { %v983_v43 = vpop.f32.mrf.mxu1 }
 0x2f1   :  { %v984_v44 = vadd.f32 %v1066_v42, %v983_v43 }
 0x2f2   :  { %v1360_v45 = vpop.f32.mrf.mxu1 }
 0x2f3   :  { %987 = vst [vmem:[#allocation2] sm:$0x3] %v984_v44 }
 0x2f4   :  { %1377 = shalt.err (!%p1374_p4)
}
 0x2f5   :  { %997 = dma.vmem_to_hbm [thread:$0]  %s995_s6, 32, %s1855_s5, [#allocation3]  }
 0x2f6   :  { %1386 = dma.done.wait [#allocation3], 32  }
 0x2f7   :  { %1387 = vsyncadd [#allocation3], 4294967264 }
 0x2f8   :  { %1001 = vsyncpa [#allocation3], 1 }

</bundles_post_ra>
